<compile_context>
chip_gen: v7x
topology: tpu7x:2x2x1
jax: 0.10.0
libtpu: 0.0.40
codegen_flags: <defaults>
</compile_context>

<pallas_src>
import functools
import math
from functools import reduce
from operator import mul

import jax
import jax.numpy as jnp
from jax.experimental import pallas as pl
from jax.experimental.pallas import tpu as pltpu

LANES = 128
MAX_BLOCK_ROWS = 1024  # 1024 x 128 f32 = 512 KiB per block buffer


def _pick_block_rows(rows: int) -> int:
    if rows <= MAX_BLOCK_ROWS:
        return rows          # single block == full dim (always a legal block)
    return MAX_BLOCK_ROWS    # multiple of 8 (f32 tiling) and 32 (int8 tiling)


def _make_kernel(additive: bool, trace_scale: float):
    def kernel(decay_ref, x_ref, tr_init_ref, s_ref, tr_ref):
        t = pl.program_id(1)

        # Load the trace state into the VMEM-resident output block once per
        # row-block; it stays resident across the whole time axis.
        @pl.when(t == 0)
        def _():
            tr_ref[...] = tr_init_ref[...]

        decay = decay_ref[0]                      # precomputed exp(-dt/tau_s)
        x = x_ref[0]                              # (block_rows, 128)
        spike = x != jnp.float32(0.0)             # self.s = traces.bool()
        decayed = tr_ref[...] * decay             # self.traces *= trace_decay
        if additive:
            tr_ref[...] = decayed + jnp.float32(trace_scale) * spike.astype(
                jnp.float32
            )
        else:
            # self.traces.masked_fill_(self.s, 1)
            tr_ref[...] = jnp.where(spike, jnp.float32(1.0), decayed)
        s_ref[0] = spike.astype(jnp.int8)         # 1 B/elem spike writeback

    return kernel


@functools.partial(
    jax.jit,
    static_argnames=("additive", "trace_scale", "block_rows"),
    donate_argnums=(1,),  # trace state updated in place (aliased to output 1)
)
def _fused_steps(x3d, tr2d, decay_arr, *, additive, trace_scale, block_rows):
    T, R, C = x3d.shape
    row_blocks = pl.cdiv(R, block_rows)
    kernel = _make_kernel(additive, trace_scale)
    return pl.pallas_call(
        kernel,
        out_shape=(
            jax.ShapeDtypeStruct((T, R, C), jnp.int8),    # spikes, all T steps
            jax.ShapeDtypeStruct((R, C), jnp.float32),    # final traces
        ),
        grid=(row_blocks, T),
        in_specs=[
            pl.BlockSpec(memory_space=pltpu.SMEM),                     # decay
            pl.BlockSpec((1, block_rows, C), lambda i, t: (t, i, 0)),  # inputs
            pl.BlockSpec((block_rows, C), lambda i, t: (i, 0)),        # traces in
        ],
        out_specs=(
            pl.BlockSpec((1, block_rows, C), lambda i, t: (t, i, 0)),  # spikes
            pl.BlockSpec((block_rows, C), lambda i, t: (i, 0)),        # resident
        ),
        input_output_aliases={2: 1},  # traces-in (arg 2) -> traces-out (out 1)
        compiler_params=pltpu.CompilerParams(
            dimension_semantics=("parallel", "arbitrary"),
        ),
    )(decay_arr, x3d, tr2d)


class InputPopulation:
    """JAX/Pallas re-implementation of cnsproject InputPopulation."""

    def __init__(self, shape, spike_trace=True, additive_spike_trace=False,
                 tau_s=10.0, trace_scale=1.0, learning=True):
        self.shape = tuple(shape)
        self.n = reduce(mul, self.shape)
        # TODO(synk): populations whose size is not a multiple of 128 would
        # need lane padding in the wrapper; not required for this spec.
        assert self.n % LANES == 0, "population size must be a multiple of 128"
        self.rows = self.n // LANES
        self.block_rows = _pick_block_rows(self.rows)
        self.spike_trace = spike_trace
        self.additive_spike_trace = additive_spike_trace
        self.tau_s = float(tau_s)
        self.trace_scale = float(trace_scale)
        self.learning = learning
        self.dt = None
        # state buffers (traces kept f32 to match the PyTorch reference;
        # bf16 storage would halve trace traffic if looser precision is OK)
        self.traces = jnp.zeros(self.shape, jnp.float32)
        self.s = jnp.zeros(self.shape, jnp.bool_)

    def reset_state_variables(self):
        self.traces = jnp.zeros(self.shape, jnp.float32)
        self.s = jnp.zeros(self.shape, jnp.bool_)

    def _decay(self):
        if self.dt is None:
            raise RuntimeError("set population.dt before calling forward()")
        return math.exp(-float(self.dt) / self.tau_s)

    def forward_steps(self, traces_seq):
        """Run T fused timesteps; traces_seq has shape (T, *self.shape)."""
        T = traces_seq.shape[0]
        x3d = traces_seq.astype(jnp.float32).reshape(T, self.rows, LANES)
        tr2d = jnp.reshape(self.traces.astype(jnp.float32), (self.rows, LANES))
        if tr2d is self.traces:
            # identity reshape can alias; copy so donation cannot invalidate
            # externally held references to self.traces
            tr2d = tr2d.copy()
        decay_arr = jnp.full((1,), self._decay(), jnp.float32)
        s_i8, new_tr = _fused_steps(
            x3d, tr2d, decay_arr,
            additive=self.additive_spike_trace,
            trace_scale=self.trace_scale,
            block_rows=self.block_rows,
        )
        spikes = s_i8.astype(jnp.bool_).reshape((T,) + self.shape)
        self.s = spikes[-1]
        if self.spike_trace:
            self.traces = new_tr.reshape(self.shape)
        return spikes, self.traces

    def forward(self, traces_in):
        spikes, traces = self.forward_steps(traces_in[None, ...])
        self.s = spikes[0]
        return self.s, traces


def _reference_step(x, traces, dt, tau_s, additive, trace_scale):
    spike = x != 0.0
    decay = jnp.exp(jnp.float32(-dt) / jnp.float32(tau_s))
    decayed = traces * decay
    if additive:
        new_tr = decayed + trace_scale * spike.astype(jnp.float32)
    else:
        new_tr = jnp.where(spike, 1.0, decayed)
    return spike, new_tr


if __name__ == "__main__":
    key = jax.random.PRNGKey(0)
    pop_shape = (4, 16, 16)  # n = 1024 neurons
    k1, k2, k3, k4 = jax.random.split(key, 4)

    spikes_step1 = (jax.random.uniform(k1, pop_shape) < 0.3).astype(jnp.float32)
    spikes_step2 = (jax.random.uniform(k2, pop_shape) < 0.3).astype(jnp.float32)
    init_tr = jax.random.uniform(k3, pop_shape, dtype=jnp.float32)

    # ---- single-step path (non-additive, default config) ----
    pop = InputPopulation(pop_shape, tau_s=10.0)
    pop.dt = 1.0
    pop.reset_state_variables()
    pop.traces = init_tr * 1.0  # independent buffer from init_tr

    ref_tr = init_tr
    ref_s1, ref_tr = _reference_step(spikes_step1, ref_tr, 1.0, 10.0, False, 1.0)
    ref_s2, ref_tr = _reference_step(spikes_step2, ref_tr, 1.0, 10.0, False, 1.0)

    s1, tr1 = pop.forward(spikes_step1)
    jax.block_until_ready((s1, tr1))
    assert bool(jnp.all(s1 == ref_s1))
    s2, tr2 = pop.forward(spikes_step2)
    jax.block_until_ready((s2, tr2))
    assert bool(jnp.all(s2 == ref_s2))
    assert float(jnp.max(jnp.abs(tr2 - ref_tr))) < 1e-5

    # ---- fused multi-timestep path (traces resident in VMEM across T) ----
    T = 6
    pop2 = InputPopulation(pop_shape, tau_s=10.0)
    pop2.dt = 0.5
    pop2.traces = init_tr * 1.0
    xs = (jax.random.uniform(k4, (T,) + pop_shape) < 0.25).astype(jnp.float32)
    s_seq, tr_T = pop2.forward_steps(xs)
    jax.block_until_ready((s_seq, tr_T))
    rtr = init_tr
    for t in range(T):
        rs, rtr = _reference_step(xs[t], rtr, 0.5, 10.0, False, 1.0)
        assert bool(jnp.all(s_seq[t] == rs))
    assert float(jnp.max(jnp.abs(tr_T - rtr))) < 1e-5

    # ---- additive spike trace mode ----
    pop3 = InputPopulation(pop_shape, additive_spike_trace=True,
                           tau_s=10.0, trace_scale=0.7)
    pop3.dt = 1.0
    pop3.traces = init_tr * 1.0
    s3, tr3 = pop3.forward(spikes_step1)
    jax.block_until_ready((s3, tr3))
    ref_s3, ref_tr3 = _reference_step(spikes_step1, init_tr, 1.0, 10.0, True, 0.7)
    assert bool(jnp.all(s3 == ref_s3))
    assert float(jnp.max(jnp.abs(tr3 - ref_tr3))) < 1e-5

    print("KERNEL_OK")
</pallas_src>

<mosaic_0001>
module attributes {stable_mosaic.version = 11 : i64} {
  func.func @kernel(%arg0: i32, %arg1: i32, %arg2: memref<1xf32, #tpu.memory_space<smem>>, %arg3: memref<1x8x128xf32, #tpu.memory_space<vmem>>, %arg4: memref<8x128xf32, #tpu.memory_space<vmem>>, %arg5: memref<1x8x128xi8, #tpu.memory_space<vmem>>, %arg6: memref<8x128xf32, #tpu.memory_space<vmem>>) attributes {dimension_semantics = [#tpu.dimension_semantics<parallel>, #tpu.dimension_semantics<arbitrary>], iteration_bounds = array<i64: 1, 1>, scalar_prefetch = 0 : i64, scratch_operands = 0 : i64, tpu.core_type = #tpu.core_type<tc>, window_params = [{transform_indices = @transform_0, window_bounds = array<i64: 1>}, {transform_indices = @transform_1, window_bounds = array<i64: 1, 8, 128>}, {transform_indices = @transform_2, window_bounds = array<i64: 8, 128>}, {transform_indices = @transform_3, window_bounds = array<i64: 1, 8, 128>}, {transform_indices = @transform_4, window_bounds = array<i64: 8, 128>}]} {
    %c0_i32 = arith.constant 0 : i32
    %0 = arith.cmpi eq, %arg1, %c0_i32 : i32
    %1 = arith.extui %0 : i1 to i32
    %c0_i32_0 = arith.constant 0 : i32
    %2 = arith.cmpi ne, %1, %c0_i32_0 : i32
    scf.if %2 {
      %c0_12 = arith.constant 0 : index
      %c0_13 = arith.constant 0 : index
      %18 = vector.load %arg4[%c0_12, %c0_13] : memref<8x128xf32, #tpu.memory_space<vmem>>, vector<8x128xf32>
      %c0_14 = arith.constant 0 : index
      %c0_15 = arith.constant 0 : index
      %19 = vector.load %arg6[%c0_14, %c0_15] : memref<8x128xf32, #tpu.memory_space<vmem>>, vector<8x128xf32>
      tpu.vector_store %arg6[%c0_14, %c0_15], %18 {strides = array<i32>} : memref<8x128xf32, #tpu.memory_space<vmem>>, vector<8x128xf32>,
    } else {
    }
    %c0 = arith.constant 0 : index
    %3 = memref.load %arg2[%c0] : memref<1xf32, #tpu.memory_space<smem>>
    %c0_1 = arith.constant 0 : index
    %c0_2 = arith.constant 0 : index
    %c0_3 = arith.constant 0 : index
    %4 = vector.load %arg3[%c0_1, %c0_2, %c0_3] : memref<1x8x128xf32, #tpu.memory_space<vmem>>, vector<1x8x128xf32>
    %5 = vector.shape_cast %4 : vector<1x8x128xf32> to vector<8x128xf32>
    %cst = arith.constant 0.000000e+00 : f32
    %6 = vector.broadcast %cst : f32 to vector<8x128xf32>
    %7 = arith.cmpf one, %5, %6 : vector<8x128xf32>
    %c0_4 = arith.constant 0 : index
    %c0_5 = arith.constant 0 : index
    %8 = vector.load %arg6[%c0_4, %c0_5] : memref<8x128xf32, #tpu.memory_space<vmem>>, vector<8x128xf32>
    %9 = vector.broadcast %3 : f32 to vector<8x128xf32>
    %10 = arith.mulf %8, %9 : vector<8x128xf32>
    %cst_6 = arith.constant 1.000000e+00 : f32
    %11 = vector.broadcast %cst_6 : f32 to vector<8x128xf32>
    %12 = arith.select %7, %11, %10 : vector<8x128xi1>, vector<8x128xf32>
    %c0_7 = arith.constant 0 : index
    %c0_8 = arith.constant 0 : index
    %13 = vector.load %arg6[%c0_7, %c0_8] : memref<8x128xf32, #tpu.memory_space<vmem>>, vector<8x128xf32>
    tpu.vector_store %arg6[%c0_7, %c0_8], %12 {strides = array<i32>} : memref<8x128xf32, #tpu.memory_space<vmem>>, vector<8x128xf32>,
    %14 = arith.extui %7 : vector<8x128xi1> to vector<8x128xi8>
    %c0_9 = arith.constant 0 : index
    %c0_10 = arith.constant 0 : index
    %c0_11 = arith.constant 0 : index
    %15 = vector.load %arg5[%c0_9, %c0_10, %c0_11] : memref<1x8x128xi8, #tpu.memory_space<vmem>>, vector<1x8x128xi8>
    %16 = vector.shape_cast %15 : vector<1x8x128xi8> to vector<8x128xi8>
    %17 = vector.shape_cast %14 : vector<8x128xi8> to vector<1x8x128xi8>
    tpu.vector_store %arg5[%c0_9, %c0_10, %c0_11], %17 {strides = array<i32>} : memref<1x8x128xi8, #tpu.memory_space<vmem>>, vector<1x8x128xi8>,
    return
  }
  func.func @transform_0(%arg0: i32, %arg1: i32) -> i32 {
    %c0_i32 = arith.constant 0 : i32
    %c0_i32_0 = arith.constant 0 : i32
    return %c0_i32 : i32
  }
  func.func @transform_1(%arg0: i32, %arg1: i32) -> (i32, i32, i32) {
    %c0_i32 = arith.constant 0 : i32
    %c0_i32_0 = arith.constant 0 : i32
    return %arg1, %arg0, %c0_i32 : i32, i32, i32
  }
  func.func @transform_2(%arg0: i32, %arg1: i32) -> (i32, i32) {
    %c0_i32 = arith.constant 0 : i32
    %c0_i32_0 = arith.constant 0 : i32
    return %arg0, %c0_i32 : i32, i32
  }
  func.func @transform_3(%arg0: i32, %arg1: i32) -> (i32, i32, i32) {
    %c0_i32 = arith.constant 0 : i32
    %c0_i32_0 = arith.constant 0 : i32
    return %arg1, %arg0, %c0_i32 : i32, i32, i32
  }
  func.func @transform_4(%arg0: i32, %arg1: i32) -> (i32, i32) {
    %c0_i32 = arith.constant 0 : i32
    %c0_i32_0 = arith.constant 0 : i32
    return %arg0, %c0_i32 : i32, i32
  }
}

</mosaic_0001>

<bundles_post_ra>
// kernel: _fused_steps.1
= control target key start
LH: loop header
LB: loop body
LE: loop exit
PB: predicated region body
PF: predicated region fallthrough
CT: control target
= control target key end

     0   :  { %11 = vsyncpa [#allocation4], 0  ;;  %s282_s0 = inlined_call_operand.<no memory space> [shape: f32[1], index: 0, kind: input, shape index: {}]   ;;  %s283_s1 = inlined_call_operand.hbm [shape: f32[1,8,128], index: 1, kind: input, shape index: {}]   ;;  %s284_s2 = inlined_call_operand.hbm [shape: f32[8,128], index: 2, kind: input, shape index: {}, may-alias: {2,4}]   ;;  %s285_s3 = inlined_call_operand.hbm [shape: s8[1,8,128], index: 3, kind: output, shape index: {0}]   ;;  %s286_s4 = inlined_call_operand.hbm [shape: f32[8,128], index: 4, kind: output, shape index: {1}, may-alias: {2,4}]  }
   0x1   :  { %12 = vsyncpa [#allocation7], 0 }
   0x2   :  { %13 = vsyncpa [#allocation5], 0 }
   0x3   :  { %14 = vsyncpa [#allocation10], 0  ;;  %s194_s15 = smov [#allocation3]   ;;  %s195_s17 = smov [#allocation6]  }
   0x4   :  { %s23_s16 = sshll.u32 %s194_s15, 4  ;;  %s33_s18 = sshll.u32 %s195_s17, 4  ;;  %s24_s16 = int_to_ptr.vmem [resolvable:$true] %s23_s16  ;;  %s34_s18 = int_to_ptr.vmem [resolvable:$true] %s33_s18 }
   0x5   :  { %s98_s21 = scalar_lea.hbm %s283_s1, 128 }
   0x6   :  { %p99_p0 = scmp.ne.s32.totalorder %s283_s1, %s98_s21  ;;  %p102_p1 = scmp.lt.u32.totalorder %s98_s21, %s283_s1 }
   0x8   :  { %p104_p2 = pnand %p102_p1, %p99_p0 }
   0xa   :  { %107 = shalt.err (!%p104_p2)
}
   0xb   :  { %s108_s26 = scalar_lea.vmem %s24_s16, 128  ;;  %p113_p4 = scmp.lt.s32.totalorder %s24_s16, %s24_s16 }
   0xc   :  { %p109_p3 = scmp.ne.s32.totalorder %s24_s16, %s108_s26  ;;  %p114_p5 = scmp.lt.s32.totalorder %s108_s26, %s108_s26 }
   0xe   :  { %p115_p6 = por %p114_p5, %p113_p4 }
  0x10   :  { %p116_p7 = pnand %p115_p6, %p109_p3 }
  0x12   :  { %119 = shalt.err (!%p116_p7)
}
  0x13   :  { %26 = dma.hbm_to_vmem [thread:$0]  %s283_s1, 128, %s24_s16, [#allocation4]  }
  0x14   :  { %s120_s5 = scalar_lea.hbm %s284_s2, 128 }
  0x15   :  { %p121_p8 = scmp.ne.s32.totalorder %s284_s2, %s120_s5  ;;  %p124_p9 = scmp.lt.u32.totalorder %s120_s5, %s284_s2 }
  0x17   :  { %p126_p10 = pnand %p124_p9, %p121_p8 }
  0x19   :  { %129 = shalt.err (!%p126_p10)
}
  0x1a   :  { %s130_s10 = scalar_lea.vmem %s34_s18, 128  ;;  %p135_p12 = scmp.lt.s32.totalorder %s34_s18, %s34_s18 }
  0x1b   :  { %p131_p11 = scmp.ne.s32.totalorder %s34_s18, %s130_s10  ;;  %p136_p13 = scmp.lt.s32.totalorder %s130_s10, %s130_s10 }
  0x1d   :  { %p137_p0 = por %p136_p13, %p135_p12 }
  0x1f   :  { %p138_p1 = pnand %p137_p0, %p131_p11 }
  0x21   :  { %141 = shalt.err (!%p138_p1)
}
  0x22   :  { %36 = dma.hbm_to_vmem [thread:$0]  %s284_s2, 128, %s34_s18, [#allocation7]  }
  0x23   :  { %186 = dma.done.wait [#allocation4], 128  }
  0x24   :  { %187 = vsyncadd [#allocation4], 4294967168 }
  0x25   :  { %188 = dma.done.wait [#allocation7], 128  }
  0x26   :  { %189 = vsyncadd [#allocation7], 4294967168  ;;  %v55_v0 = vstv %s282_s0  ;;  %s196_s14 = smov [#allocation9]   ;;  %v49_v1 = vld [vmem:[#allocation6] sm:$0xff]  ;;  %v52_v2 = vld [vmem:[#allocation3] sm:$0xff]  ;;  %s197_s16 = smov [#allocation8]  }
  0x27   :  { %s79_s15 = sshll.u32 %s196_s14, 4  ;;  %s69_s17 = sshll.u32 %s197_s16, 4  ;;  %vm53_vm0 = vcmp.ne.f32.partialorder %v52_v2, 0.0  ;;  %v56_v3 = vmul.f32 %v55_v0, %v49_v1  ;;  %v198_v5 = vmov 0   ;;  %s80_s15 = int_to_ptr.vmem [resolvable:$true] %s79_s15  ;;  %s251_s17 = int_to_ptr.vmem [resolvable:$true] %s69_s17 }
  0x28   :  { %vm59_vm1 = vmpackc.low %vm53_vm0, %vm53_vm0  ;;  %s142_s2 = scalar_lea.vmem %s80_s15, 128  ;;  %p147_p3 = scmp.lt.s32.totalorder %s80_s15, %s80_s15 }
  0x29   :  { %v57_v4 = vsel %vm53_vm0, 1.0, %v56_v3  ;;  %vm60_vm2 = vmpackc.even %vm59_vm1, %vm59_vm1  ;;  %p143_p2 = scmp.ne.s32.totalorder %s80_s15, %s142_s2  ;;  %p148_p4 = scmp.lt.s32.totalorder %s142_s2, %s142_s2 }
  0x2a   :  { %58 = vst [vmem:[#allocation9] sm:$0xff] %v57_v4  ;;  %v61_v6 = vsel %vm60_vm2, 16843009, %v198_v5 }
  0x2b   :  { %62 = vst [vmem:[#allocation8] sm:$0x3] %v61_v6  ;;  %p149_p5 = por %p148_p4, %p147_p3 }
  0x2d   :  { %p150_p6 = pnand %p149_p5, %p143_p2 }
  0x2f   :  { %153 = shalt.err (!%p150_p6)
}
  0x30   :  { %s154_s19 = scalar_lea.hbm %s286_s4, 128 }
  0x31   :  { %p155_p7 = scmp.ne.s32.totalorder %s286_s4, %s154_s19  ;;  %p158_p8 = scmp.lt.u32.totalorder %s154_s19, %s286_s4 }
  0x33   :  { %p160_p9 = pnand %p158_p8, %p155_p7 }
  0x35   :  { %163 = shalt.err (!%p160_p9)
}
  0x36   :  { %82 = dma.vmem_to_hbm [thread:$0]  %s80_s15, 128, %s286_s4, [#allocation10]  }
  0x37   :  { %s164_s26 = scalar_lea.vmem %s251_s17, 32  ;;  %p169_p11 = scmp.lt.s32.totalorder %s251_s17, %s251_s17 }
  0x38   :  { %p165_p10 = scmp.ne.s32.totalorder %s251_s17, %s164_s26  ;;  %p170_p12 = scmp.lt.s32.totalorder %s164_s26, %s164_s26 }
  0x3a   :  { %p171_p13 = por %p170_p12, %p169_p11 }
  0x3c   :  { %p172_p0 = pnand %p171_p13, %p165_p10 }
  0x3e   :  { %175 = shalt.err (!%p172_p0)
}
  0x3f   :  { %s176_s29 = scalar_lea.hbm %s285_s3, 32 }
  0x40   :  { %p177_p1 = scmp.ne.s32.totalorder %s285_s3, %s176_s29  ;;  %p180_p2 = scmp.lt.u32.totalorder %s176_s29, %s285_s3 }
  0x42   :  { %p182_p3 = pnand %p180_p2, %p177_p1 }
  0x44   :  { %185 = shalt.err (!%p182_p3)
}
  0x45   :  { %72 = dma.vmem_to_hbm [thread:$0]  %s251_s17, 32, %s285_s3, [#allocation5]  }
  0x46   :  { %190 = dma.done.wait [#allocation5], 32  }
  0x47   :  { %191 = vsyncadd [#allocation5], 4294967264 }
  0x48   :  { %192 = dma.done.wait [#allocation10], 128  }
  0x49   :  { %193 = vsyncadd [#allocation10], 4294967168 }
  0x4a   :  { %89 = vsyncpa [#allocation4], 1 }
  0x4b   :  { %90 = vsyncpa [#allocation7], 1 }
  0x4c   :  { %91 = vsyncpa [#allocation5], 1 }
  0x4d   :  { %92 = vsyncpa [#allocation10], 1 }

</bundles_post_ra>
